<compile_context>
chip_gen: v7x
topology: tpu7x:2x2x1
jax: 0.10.0
libtpu: 0.0.40
codegen_flags: <defaults>
</compile_context>

<pallas_src>
import functools
import math

import jax
import jax.numpy as jnp
from jax.experimental import pallas as pl
from jax.experimental.pallas import tpu as pltpu

EPS = 1e-6
NEG_BIG = -1e30  # finite "masked" fill value (avoids NaN on fully-masked rows)


# ---------------------------------------------------------------------------
# In-kernel LayerNormalization with PyTorch semantics:
#   unbiased std (divide by d-1), eps added to the *std* (not the variance).
def _layernorm_rows(x, alpha, bias):
    d = x.shape[-1]
    mean = jnp.mean(x, axis=-1, keepdims=True)
    centered = x - mean
    var = jnp.sum(centered * centered, axis=-1, keepdims=True) * (1.0 / (d - 1))
    std = jnp.sqrt(var)
    inv = pl.reciprocal(std + EPS, approx=True)     # EUP slot, ~free
    return alpha * (centered * inv) + bias


# --- K1: fused LayerNorm0 + packed QKV projection ---------------------------
def _ln_qkv_kernel(x_ref, alpha_ref, bias_ref, wqkv_ref, bqkv_ref, qkv_ref):
    x = x_ref[...].astype(jnp.float32)
    y = _layernorm_rows(x, alpha_ref[...], bias_ref[...])
    qkv = jnp.dot(y, wqkv_ref[...], preferred_element_type=jnp.float32)
    qkv_ref[...] = (qkv + bqkv_ref[...]).astype(qkv_ref.dtype)


# --- K2: per-batch attention (all heads) + Wo projection + residual ---------
def _attn_proj_residual_kernel(x_ref, qkv_ref, mask_ref, wo_ref, bo_ref, o_ref,
                               *, num_heads, scale):
    x = x_ref[...].astype(jnp.float32)              # (s, d)   residual input
    qkv = qkv_ref[...].astype(jnp.float32)          # (s, 3*d) packed Q|K|V
    mask = mask_ref[...]                            # (sq, s)  sq in {1, s}
    wo = wo_ref[...]                                # (d, d)   f32
    s, d = x.shape
    dk = d // num_heads

    acc = jnp.zeros((s, d), jnp.float32)
    for h in range(num_heads):                      # unrolled, num_heads small
        q = qkv[:, h * dk:(h + 1) * dk]
        k = qkv[:, d + h * dk: d + (h + 1) * dk]
        v = qkv[:, 2 * d + h * dk: 2 * d + (h + 1) * dk]
        # scores = q @ k^T / sqrt(dk)
        scores = jax.lax.dot_general(
            q, k, (((1,), (1,)), ((), ())),
            preferred_element_type=jnp.float32) * scale
        scores = jnp.where(mask == 0, NEG_BIG, scores)
        row_max = jnp.max(scores, axis=-1, keepdims=True)
        p = jnp.exp(scores - row_max)
        denom = jnp.sum(p, axis=-1, keepdims=True)
        p = p * pl.reciprocal(denom, approx=True)
        out_h = jnp.dot(p, v, preferred_element_type=jnp.float32)
        # Fold the head-concat into the Wo contraction.
        acc = acc + jnp.dot(out_h, wo[h * dk:(h + 1) * dk, :],
                            preferred_element_type=jnp.float32)

    o_ref[...] = (x + acc + bo_ref[...]).astype(o_ref.dtype)


# --- K3: fused LayerNorm1 + FFN + residual add -------------------------------
def _ln_ffn_residual_kernel(x_ref, alpha_ref, bias_ref, w1_ref, b1_ref,
                            w2_ref, b2_ref, o_ref):
    x = x_ref[...].astype(jnp.float32)
    y = _layernorm_rows(x, alpha_ref[...], bias_ref[...])
    h = jnp.dot(y, w1_ref[...], preferred_element_type=jnp.float32) + b1_ref[...]
    h = jnp.maximum(h, 0.0)                         # relu
    out = jnp.dot(h, w2_ref[...], preferred_element_type=jnp.float32) + b2_ref[...]
    o_ref[...] = (x + out).astype(o_ref.dtype)


# ---------------------------------------------------------------------------
def _pick_tile_rows(rows, dtype, max_rows=512):
    """Largest sublane-aligned row tile dividing `rows`, with >= 2 grid steps."""
    packing = max(1, 4 // jnp.dtype(dtype).itemsize)   # bf16 -> 16, int8 -> 32
    base = 8 * packing
    cap = min(max_rows, rows)
    if rows >= 2 * base:
        cap = min(cap, rows // 2)          # guarantee >= 2 grid steps (v7x)
    cap -= cap % base
    for t in range(cap, base - 1, -base):
        if t > 0 and rows % t == 0:
            return t
    return rows                            # single full tile (always legal)


def _vmem_limit_bytes(total_block_elems):
    """Scoped-VMEM budget: double-buffered f32 blocks + margin, clamped."""
    need = 2 * int(total_block_elems) * 4 + (2 << 20)
    return int(min(max(need, 16 << 20), 64 << 20))


def encoder_block_forward(x, src_mask, params, *, num_heads, tile_rows=None):
    """EncoderBlock.forward (inference) built from 3 fused Pallas kernels."""
    b, s, d = x.shape
    dk = d // num_heads
    rows = b * s
    dtype = x.dtype

    if tile_rows is None or rows % tile_rows != 0:
        tile_rows = _pick_tile_rows(rows, dtype)
    grid_rows = rows // tile_rows

    f32 = jnp.float32
    x2 = x.reshape(rows, d)

    # Hoist all parameter casts/reshapes out of the kernels (done once here).
    # TODO(synk): for bf16 deployments keep MXU operands bf16 (LN stats stay f32).
    ln1_a = params["ln1_alpha"].astype(f32).reshape(1, d)
    ln1_b = params["ln1_bias"].astype(f32).reshape(1, d)
    ln2_a = params["ln2_alpha"].astype(f32).reshape(1, d)
    ln2_b = params["ln2_bias"].astype(f32).reshape(1, d)
    wqkv = jnp.concatenate(
        [params["wq"], params["wk"], params["wv"]], axis=1).astype(f32)
    bqkv = jnp.concatenate(
        [params["bq"], params["bk"], params["bv"]], axis=0).reshape(1, 3 * d).astype(f32)
    wo = params["wo"].astype(f32)
    bo = params["bo"].reshape(1, d).astype(f32)
    w1 = params["w1"].astype(f32)
    b1 = params["b1"].reshape(1, -1).astype(f32)
    w2 = params["w2"].astype(f32)
    b2 = params["b2"].reshape(1, d).astype(f32)
    d_ff = w1.shape[1]

    # Key-padding style mask kept tiny: (b, sq, s), sq is 1 for (b,1,1,s) masks.
    sq = src_mask.shape[-2]
    mask_small = jnp.broadcast_to(
        src_mask, (b, 1, sq, s)).reshape(b, sq, s).astype(f32)

    # --- K1: LN0 + packed QKV projection ------------------------------------
    k1_elems = (tile_rows * d + 2 * d + d * 3 * d + 3 * d + tile_rows * 3 * d)
    qkv = pl.pallas_call(
        _ln_qkv_kernel,
        out_shape=jax.ShapeDtypeStruct((rows, 3 * d), dtype),
        grid_spec=pltpu.PrefetchScalarGridSpec(
            num_scalar_prefetch=0,
            grid=(grid_rows,),
            in_specs=[
                pl.BlockSpec((tile_rows, d), lambda i: (i, 0)),
                pl.BlockSpec((1, d), lambda i: (0, 0)),
                pl.BlockSpec((1, d), lambda i: (0, 0)),
                pl.BlockSpec((d, 3 * d), lambda i: (0, 0)),
                pl.BlockSpec((1, 3 * d), lambda i: (0, 0)),
            ],
            out_specs=pl.BlockSpec((tile_rows, 3 * d), lambda i: (i, 0)),
        ),
        compiler_params=pltpu.CompilerParams(
            dimension_semantics=("parallel",),
            vmem_limit_bytes=_vmem_limit_bytes(k1_elems)),
    )(x2, ln1_a, ln1_b, wqkv, bqkv)

    # --- K2: attention (all heads) + Wo + residual, per batch ----------------
    k2_elems = (s * d + s * 3 * d + sq * s + d * d + d + s * d)
    x_mid = pl.pallas_call(
        functools.partial(_attn_proj_residual_kernel,
                          num_heads=num_heads, scale=1.0 / math.sqrt(dk)),
        out_shape=jax.ShapeDtypeStruct((rows, d), dtype),
        grid_spec=pltpu.PrefetchScalarGridSpec(
            num_scalar_prefetch=0,
            grid=(b,),
            in_specs=[
                pl.BlockSpec((s, d), lambda bi: (bi, 0)),          # x rows of batch bi
                pl.BlockSpec((s, 3 * d), lambda bi: (bi, 0)),      # packed qkv rows
                pl.BlockSpec((None, sq, s), lambda bi: (bi, 0, 0)),  # tiny mask
                pl.BlockSpec((d, d), lambda bi: (0, 0)),           # Wo
                pl.BlockSpec((1, d), lambda bi: (0, 0)),           # bo
            ],
            out_specs=pl.BlockSpec((s, d), lambda bi: (bi, 0)),    # lane-dense
        ),
        compiler_params=pltpu.CompilerParams(
            dimension_semantics=("parallel",),
            vmem_limit_bytes=_vmem_limit_bytes(k2_elems)),
    )(x2, qkv, mask_small, wo, bo)

    # --- K3: LN1 + FFN + residual --------------------------------------------
    k3_elems = (2 * tile_rows * d + 2 * d + d * d_ff + d_ff + d_ff * d + d)
    out = pl.pallas_call(
        _ln_ffn_residual_kernel,
        out_shape=jax.ShapeDtypeStruct((rows, d), dtype),
        grid_spec=pltpu.PrefetchScalarGridSpec(
            num_scalar_prefetch=0,
            grid=(grid_rows,),
            in_specs=[
                pl.BlockSpec((tile_rows, d), lambda i: (i, 0)),
                pl.BlockSpec((1, d), lambda i: (0, 0)),
                pl.BlockSpec((1, d), lambda i: (0, 0)),
                pl.BlockSpec((d, d_ff), lambda i: (0, 0)),
                pl.BlockSpec((1, d_ff), lambda i: (0, 0)),
                pl.BlockSpec((d_ff, d), lambda i: (0, 0)),
                pl.BlockSpec((1, d), lambda i: (0, 0)),
            ],
            out_specs=pl.BlockSpec((tile_rows, d), lambda i: (i, 0)),
        ),
        compiler_params=pltpu.CompilerParams(
            dimension_semantics=("parallel",),
            vmem_limit_bytes=_vmem_limit_bytes(k3_elems)),
    )(x_mid, ln2_a, ln2_b, w1, b1, w2, b2)

    return out.reshape(b, s, d)


# ---------------------------------------------------------------------------
def _reference(x, src_mask, params, num_heads):
    """Pure-JAX mirror of the PyTorch EncoderBlock forward (eval mode)."""
    def ln(t, alpha, bias):
        mean = jnp.mean(t, -1, keepdims=True)
        std = jnp.std(t, -1, keepdims=True, ddof=1)   # unbiased, as torch.std
        return alpha * ((t - mean) / (std + EPS)) + bias

    b, s, d = x.shape
    dk = d // num_heads
    y = ln(x, params["ln1_alpha"], params["ln1_bias"])
    q = jnp.matmul(y, params["wq"]) + params["bq"]
    k = jnp.matmul(y, params["wk"]) + params["bk"]
    v = jnp.matmul(y, params["wv"]) + params["bv"]

    def split(t):
        return jnp.transpose(t.reshape(b, s, num_heads, dk), (0, 2, 1, 3))

    q, k, v = split(q), split(k), split(v)
    scores = jnp.einsum("bhqd,bhkd->bhqk", q, k) / math.sqrt(dk)
    scores = jnp.where(src_mask == 0, -jnp.inf, scores)
    p = jax.nn.softmax(scores, axis=-1)
    o = jnp.einsum("bhqk,bhkd->bhqd", p, v)
    o = jnp.transpose(o, (0, 2, 1, 3)).reshape(b, s, d)
    x = x + (jnp.matmul(o, params["wo"]) + params["bo"])

    y2 = ln(x, params["ln2_alpha"], params["ln2_bias"])
    h = jnp.maximum(jnp.matmul(y2, params["w1"]) + params["b1"], 0.0)
    x = x + (jnp.matmul(h, params["w2"]) + params["b2"])
    return x


if __name__ == "__main__":
    key = jax.random.PRNGKey(0)
    batch, seq, d_model, num_heads, d_ff = 2, 16, 128, 4, 256

    keys = jax.random.split(key, 14)
    wscale = 0.05

    def rnd(k, shape):
        return jax.random.normal(k, shape, dtype=jnp.float32) * wscale

    x = jax.random.normal(keys[0], (batch, seq, d_model), dtype=jnp.float32)
    # Padding-style mask: batch 1 masks out its last 4 key positions.
    src_mask = jnp.ones((batch, 1, 1, seq), dtype=jnp.float32)
    src_mask = src_mask.at[1, :, :, seq - 4:].set(0.0)

    params = {
        "ln1_alpha": jnp.ones((d_model,), jnp.float32),
        "ln1_bias": jnp.zeros((d_model,), jnp.float32),
        "wq": rnd(keys[1], (d_model, d_model)), "bq": rnd(keys[2], (d_model,)),
        "wk": rnd(keys[3], (d_model, d_model)), "bk": rnd(keys[4], (d_model,)),
        "wv": rnd(keys[5], (d_model, d_model)), "bv": rnd(keys[6], (d_model,)),
        "wo": rnd(keys[7], (d_model, d_model)), "bo": rnd(keys[8], (d_model,)),
        "ln2_alpha": jnp.ones((d_model,), jnp.float32),
        "ln2_bias": jnp.zeros((d_model,), jnp.float32),
        "w1": rnd(keys[9], (d_model, d_ff)), "b1": rnd(keys[10], (d_ff,)),
        "w2": rnd(keys[11], (d_ff, d_model)), "b2": rnd(keys[12], (d_model,)),
    }

    out = encoder_block_forward(x, src_mask, params, num_heads=num_heads)
    out = jax.block_until_ready(out)

    ref = _reference(x, src_mask, params, num_heads)
    assert out.shape == (batch, seq, d_model)
    max_err = float(jnp.max(jnp.abs(out - ref)))
    # Default (native MXU) precision both in the kernel and the reference;
    # tolerance covers bf16-pass rounding and the approx-EUP reciprocals.
    assert jnp.allclose(out, ref, atol=3e-2, rtol=3e-2), max_err

    print("KERNEL_OK")
</pallas_src>

<mosaic_0001>
module attributes {stable_mosaic.version = 11 : i64} {
  func.func @_ln_qkv_kernel(%arg0: i32, %arg1: memref<16x128xf32, #tpu.memory_space<vmem>>, %arg2: memref<1x128xf32, #tpu.memory_space<vmem>>, %arg3: memref<1x128xf32, #tpu.memory_space<vmem>>, %arg4: memref<128x384xf32, #tpu.memory_space<vmem>>, %arg5: memref<1x384xf32, #tpu.memory_space<vmem>>, %arg6: memref<16x384xf32, #tpu.memory_space<vmem>>) attributes {dimension_semantics = [#tpu.dimension_semantics<parallel>], iteration_bounds = array<i64: 2>, scalar_prefetch = 0 : i64, scratch_operands = 0 : i64, tpu.core_type = #tpu.core_type<tc>, window_params = [{transform_indices = @transform_0, window_bounds = array<i64: 16, 128>}, {pipeline_mode = #tpu.pipeline_mode<synchronous>, transform_indices = @transform_1, window_bounds = array<i64: 1, 128>}, {pipeline_mode = #tpu.pipeline_mode<synchronous>, transform_indices = @transform_2, window_bounds = array<i64: 1, 128>}, {pipeline_mode = #tpu.pipeline_mode<synchronous>, transform_indices = @transform_3, window_bounds = array<i64: 128, 384>}, {pipeline_mode = #tpu.pipeline_mode<synchronous>, transform_indices = @transform_4, window_bounds = array<i64: 1, 384>}, {transform_indices = @transform_5, window_bounds = array<i64: 16, 384>}]} {
    %c0 = arith.constant 0 : index
    %c0_0 = arith.constant 0 : index
    %0 = vector.load %arg1[%c0, %c0_0] : memref<16x128xf32, #tpu.memory_space<vmem>>, vector<16x128xf32>
    %c0_1 = arith.constant 0 : index
    %c0_2 = arith.constant 0 : index
    %1 = vector.load %arg2[%c0_1, %c0_2] : memref<1x128xf32, #tpu.memory_space<vmem>>, vector<1x128xf32>
    %c0_3 = arith.constant 0 : index
    %c0_4 = arith.constant 0 : index
    %2 = vector.load %arg3[%c0_3, %c0_4] : memref<1x128xf32, #tpu.memory_space<vmem>>, vector<1x128xf32>
    %cst = arith.constant dense<0.000000e+00> : vector<16xf32>
    %3 = vector.multi_reduction <add>, %0, %cst [1] : vector<16x128xf32> to vector<16xf32>
    %4 = vector.shape_cast %3 : vector<16xf32> to vector<16x1xf32>
    %cst_5 = arith.constant 1.280000e+02 : f32
    %5 = vector.broadcast %cst_5 : f32 to vector<16x1xf32>
    %6 = arith.divf %4, %5 : vector<16x1xf32>
    %7 = vector.broadcast %6 : vector<16x1xf32> to vector<16x128xf32>
    %8 = arith.subf %0, %7 : vector<16x128xf32>
    %9 = arith.mulf %8, %8 : vector<16x128xf32>
    %cst_6 = arith.constant dense<0.000000e+00> : vector<16xf32>
    %10 = vector.multi_reduction <add>, %9, %cst_6 [1] : vector<16x128xf32> to vector<16xf32>
    %11 = vector.shape_cast %10 : vector<16xf32> to vector<16x1xf32>
    %cst_7 = arith.constant 0.00787401571 : f32
    %12 = vector.broadcast %cst_7 : f32 to vector<16x1xf32>
    %13 = arith.mulf %11, %12 : vector<16x1xf32>
    %14 = math.sqrt %13 : vector<16x1xf32>
    %cst_8 = arith.constant 9.99999997E-7 : f32
    %15 = vector.broadcast %cst_8 : f32 to vector<16x1xf32>
    %16 = arith.addf %14, %15 : vector<16x1xf32>
    %17 = tpu.reciprocal %16 {approx = true} : vector<16x1xf32> -> vector<16x1xf32>
    %18 = vector.broadcast %17 : vector<16x1xf32> to vector<16x128xf32>
    %19 = arith.mulf %8, %18 : vector<16x128xf32>
    %20 = vector.broadcast %1 : vector<1x128xf32> to vector<16x128xf32>
    %21 = arith.mulf %20, %19 : vector<16x128xf32>
    %22 = vector.broadcast %2 : vector<1x128xf32> to vector<16x128xf32>
    %23 = arith.addf %21, %22 : vector<16x128xf32>
    %c0_9 = arith.constant 0 : index
    %c0_10 = arith.constant 0 : index
    %24 = vector.load %arg4[%c0_9, %c0_10] : memref<128x384xf32, #tpu.memory_space<vmem>>, vector<128x384xf32>
    %cst_11 = arith.constant dense<0.000000e+00> : vector<16x384xf32>
    %25 = tpu.matmul %23, %24, %cst_11 {dimension_numbers = #tpu.dot_dimension_numbers<[1], [0], [0], [1], [0, 0, 1, 1], [], []>} : vector<16x128xf32>, vector<128x384xf32>, vector<16x384xf32> -> vector<16x384xf32>
    %c0_12 = arith.constant 0 : index
    %c0_13 = arith.constant 0 : index
    %26 = vector.load %arg5[%c0_12, %c0_13] : memref<1x384xf32, #tpu.memory_space<vmem>>, vector<1x384xf32>
    %27 = vector.broadcast %26 : vector<1x384xf32> to vector<16x384xf32>
    %28 = arith.addf %25, %27 : vector<16x384xf32>
    %c0_14 = arith.constant 0 : index
    %c0_15 = arith.constant 0 : index
    %29 = vector.load %arg6[%c0_14, %c0_15] : memref<16x384xf32, #tpu.memory_space<vmem>>, vector<16x384xf32>
    tpu.vector_store %arg6[%c0_14, %c0_15], %28 {strides = array<i32>} : memref<16x384xf32, #tpu.memory_space<vmem>>, vector<16x384xf32>,
    return
  }
  func.func @transform_0(%arg0: i32) -> (i32, i32) {
    %c0_i32 = arith.constant 0 : i32
    %c0_i32_0 = arith.constant 0 : i32
    return %arg0, %c0_i32 : i32, i32
  }
  func.func @transform_1(%arg0: i32) -> (i32, i32) {
    %c0_i32 = arith.constant 0 : i32
    %c0_i32_0 = arith.constant 0 : i32
    %c0_i32_1 = arith.constant 0 : i32
    return %c0_i32, %c0_i32_0 : i32, i32
  }
  func.func @transform_2(%arg0: i32) -> (i32, i32) {
    %c0_i32 = arith.constant 0 : i32
    %c0_i32_0 = arith.constant 0 : i32
    %c0_i32_1 = arith.constant 0 : i32
    return %c0_i32, %c0_i32_0 : i32, i32
  }
  func.func @transform_3(%arg0: i32) -> (i32, i32) {
    %c0_i32 = arith.constant 0 : i32
    %c0_i32_0 = arith.constant 0 : i32
    %c0_i32_1 = arith.constant 0 : i32
    return %c0_i32, %c0_i32_0 : i32, i32
  }
  func.func @transform_4(%arg0: i32) -> (i32, i32) {
    %c0_i32 = arith.constant 0 : i32
    %c0_i32_0 = arith.constant 0 : i32
    %c0_i32_1 = arith.constant 0 : i32
    return %c0_i32, %c0_i32_0 : i32, i32
  }
  func.func @transform_5(%arg0: i32) -> (i32, i32) {
    %c0_i32 = arith.constant 0 : i32
    %c0_i32_0 = arith.constant 0 : i32
    return %arg0, %c0_i32 : i32, i32
  }
}

</mosaic_0001>

<bundles_post_ra>
// kernel: tpu_custom_call.1
= control target key start
LH: loop header
LB: loop body
LE: loop exit
PB: predicated region body
PF: predicated region fallthrough
CT: control target
= control target key end

     0   :  { %10 = vsyncpa [#allocation3], 0  ;;  %s1240_s0 = inlined_call_operand.hbm [shape: f32[32,128], index: 0, kind: input, shape index: {}]   ;;  %s1241_s1 = inlined_call_operand.vmem [shape: f32[1,128], index: 1, kind: input, shape index: {}]   ;;  %s1242_s2 = inlined_call_operand.vmem [shape: f32[1,128], index: 2, kind: input, shape index: {}]   ;;  %s1243_s3 = inlined_call_operand.hbm [shape: f32[128,384], index: 3, kind: input, shape index: {}]   ;;  %s1244_s4 = inlined_call_operand.vmem [shape: f32[1,384], index: 4, kind: input, shape index: {}]   ;;  %s1245_s5 = inlined_call_operand.hbm [shape: f32[32,384], index: 5, kind: output, shape index: {}]  }
   0x1   :  { %12 = vsyncpa [#allocation3 + $0x1], 0 }
   0x2   :  { %13 = vsyncpa [#allocation6], 0 }
   0x3   :  { %14 = vsyncpa [#allocation4], 0 }
   0x4   :  { %16 = vsyncpa [#allocation4 + $0x1], 0  ;;  %s1017_s18 = smov 0   ;;  %s1019_s19 = smov 0  }
   0x5   :  { %s1021_s20 = smov 0   ;;  %s1023_s21 = smov 0  }
   0x6 LB: > { %s1038_s22 = sadd.s32 4294967295, %s975_s21   ;;  %s638_s23 = sadd.s32 4294967294, %s975_s21   ;;  %s975_s21 = sphi %s1023_s21, %s1265_s21   ;;  %s971_s20 = sphi %s1021_s20, %s1264_s20   ;;  %s967_s19 = sphi %s1019_s19, %s1263_s19   ;;  %s963_s18 = sphi %s1017_s18, %s1262_s18  }
   0x7   : > { %p42_p0 = scmp.ne.s32.totalorder %s967_s19, %s963_s18  ;;  %p1246_p1 = scmp.eq.s32.totalorder %s1038_s22, 0 }
   0x8   : > { %p156_p3 = scmp.eq.s32.totalorder %s638_s23, 1  ;;  %p639_p5 = scmp.ge.s32.totalorder %s975_s21, 1 }
   0x9   : > { %p1047_p4 = por %p1246_p1, %p42_p0  ;;  %p163_p7 = scmp.lt.s32.totalorder %s975_s21, 3 }
   0xa   : > { %p1052_p6 = por %p156_p3, %p42_p0  ;;  %s977_s27 = smov [#allocation5]  }
   0xb   : > { %s1249_s24 = scalar_select %p1047_p4, 1, 0 }
   0xc   : > { %s1250_s25 = scalar_select %p1052_p6, 1, 0 }
   0xd   : > { %p1057_p8 = pnand %p639_p5, %p163_p7  ;;  %s181_s28 = sshll.u32 %s977_s27, 4  ;;  %s1061_s28 = int_to_ptr.vmem [resolvable:$true] %s181_s28 }
   0xe   : > { %s1073_s30 = sadd.s32 1, %s975_s21   ;;  %s29_s6 = sadd.s32 1, %s971_s20 }
   0xf   : > { %s1251_s26 = scalar_select %p1057_p8, 1, 0 }
  0x10   : > { %p783_p9 = pneg %p1057_p8  ;;  %s26_s7 = ssub.s32 %s975_s21, %s1073_s30 }
  0x11   : > { %s847_s10 = scalar_lea.hbm %s1243_s3, 6144 }
  0x12   : > { %p1068_p11 = pnand %p783_p9, %p1246_p1  ;;  %p848_p12 = scmp.ne.s32.totalorder %s1243_s3, %s847_s10 }
  0x13   : > { %p854_p5 = scmp.lt.u32.totalorder %s847_s10, %s1243_s3 }
  0x14   : > { %p849_p13 = pneg %p1068_p11 }
  0x16   : > { %p850_p0 = pnand %p849_p13, %p848_p12 }
  0x18   : > { %p851_p3 = pneg %p850_p0 }
  0x1a   : > { %p856_p7 = pnand %p854_p5, %p851_p3 }
  0x1c   : > { %859 = shalt.err (!%p856_p7)
}
  0x1d   : > { %s860_s15 = scalar_lea.vmem %s1061_s28, 6144  ;;  %p868_p2 = scmp.lt.s32.totalorder %s1061_s28, %s1061_s28 }
  0x1e   : > { %p861_p9 = scmp.ne.s32.totalorder %s1061_s28, %s860_s15  ;;  %p869_p6 = scmp.lt.s32.totalorder %s860_s15, %s860_s15 }
  0x20   : > { %p863_p10 = pnand %p861_p9, %p849_p13  ;;  %p870_p4 = por %p869_p6, %p868_p2 }
  0x22   : > { %p864_p1 = pneg %p863_p10 }
  0x24   : > { %p871_p8 = pnand %p870_p4, %p864_p1 }
  0x26   : > { %874 = shalt.err (!%p871_p8)
}
  0x27   : > { %s978_s16 = smov 384   ;;  %s979_s17 = smov 24  }
  0x28   : > { %786 = dma.hbm_to_vmem [thread:$0]  (!%p1068_p11), %s1243_s3, 6144, %s1061_s28, [#allocation6], %s978_s16, %s978_s16, %s979_s17  }
  0x29   : > { %p27_p2 = scmp.eq.s32.totalorder %s26_s7, 0  ;;  %p36_p1 = scmp.ne.s32.totalorder %s971_s20, %s967_s19 }
  0x2a   : > { %p37_p4 = scmp.eq.s32.totalorder %s975_s21, 0  ;;  %p796_p6 = scmp.lt.s32.totalorder %s975_s21, 2 }
  0x2b   : > { %s1104_s8 = scalar_select %p27_p2, %s971_s20, %s29_s6  }
  0x2c   : > { %p38_p8 = por %p37_p4, %p36_p1  ;;  %p1253_p10 = scmp.eq.s32.totalorder %s1038_s22, 1 }
  0x2d   : > { %s198_s10 = sand.u32 1, %s971_s20   ;;  %s655_s11 = sshll.u32 %s975_s21, 8 }
  0x2e   : > { %p1108_p12 = por %p1253_p10, %p36_p1  ;;  %s642_s12 = sshll.u32 %s198_s10, 4 }
  0x2f   : > { %s1117_s14 = scalar_lea.hbm %s1240_s0, %s655_s11  ;;  %s202_s28 = scalar_lea.vmem [#allocation2], %s642_s12 }
  0x30   : > { %s209_s6 = sshll.u32 %s202_s28, 4  ;;  %p1119_p11 = pnand %p796_p6, %p38_p8  ;;  %s1123_s6 = int_to_ptr.vmem [resolvable:$true] %s209_s6 }
  0x31   : > { %s1125_s15 = scalar_lea.sflag [#allocation3], %s198_s10  ;;  %s875_s16 = scalar_lea.hbm %s1117_s14, 256 }
  0x32   : > { %p876_p13 = scmp.ne.s32.totalorder %s1117_s14, %s875_s16  ;;  %p877_p0 = pneg %p1119_p11 }
  0x33   : > { %s880_s27 = scalar_lea.hbm %s1240_s0, 512  ;;  %p881_p7 = scmp.lt.u32.totalorder %s1117_s14, %s1240_s0 }
  0x34   : > { %p878_p3 = pnand %p877_p0, %p876_p13  ;;  %p882_p9 = scmp.lt.u32.totalorder %s880_s27, %s875_s16 }
  0x35   : > { %p884_p1 = scmp.lt.u32.totalorder %s875_s16, %s1117_s14 }
  0x36   : > { %p879_p5 = pneg %p878_p3  ;;  %p883_p2 = por %p882_p9, %p881_p7 }
  0x38   : > { %p885_p4 = por %p884_p1, %p883_p2 }
  0x3a   : > { %p886_p6 = pnand %p885_p4, %p879_p5 }
  0x3c   : > { %889 = shalt.err (!%p886_p6)
}
  0x3d   : > { %s890_s10 = scalar_lea.vmem %s1123_s6, 256  ;;  %s980_s29 = smov [#allocation2]  }
  0x3e   : > { %p891_p8 = scmp.ne.s32.totalorder %s1123_s6, %s890_s10  ;;  %s895_s13 = sshll.u32 %s980_s29, 4  ;;  %s896_s13 = int_to_ptr.vmem [resolvable:$false] %s895_s13 }
  0x3f   : > { %s897_s28 = scalar_lea.vmem %s896_s13, 512  ;;  %p898_p3 = scmp.lt.s32.totalorder %s1123_s6, %s896_s13 }
  0x40   : > { %p893_p10 = pnand %p891_p8, %p877_p0  ;;  %p899_p7 = scmp.lt.s32.totalorder %s897_s28, %s890_s10 }
  0x42   : > { %p894_p13 = pneg %p893_p10  ;;  %p900_p9 = por %p899_p7, %p898_p3 }
  0x44   : > { %p901_p2 = pnand %p900_p9, %p894_p13 }
  0x46   : > { %904 = shalt.err (!%p901_p2)
}
  0x47   : > { %s981_s16 = smov 128   ;;  %s982_s17 = smov 8  }
  0x48   : > { %790 = dma.hbm_to_vmem [thread:$0]  (!%p1119_p11), %s1117_s14, 256, %s1123_s6, %s1125_s15, %s981_s16, %s981_s16, %s982_s17  }
  0x49   : > { %p1256_p0 = scmp.ne.s32.totalorder %s1251_s26, 0 }
  0x4a   : > { %s1156_s23 = sand.u32 (!%p1256_p0), 1, %s967_s19   ;;  %p1257_p5 = scmp.ne.s32.totalorder (!%p1256_p0), %s1249_s24, 0 }
  0x4b   : > { %221 = sbr.rel (%p1256_p0) target bundleno = 647 (0x287), region = 40  ;;  %s646_s27 = sshll.u32 (!%p1256_p0), %s1156_s23, 4 }
  0x4c   : > { %s224_s11 = scalar_lea.sflag (!%p1256_p0), [#allocation3], %s1156_s23  ;;  %s227_s12 = scalar_lea.vmem (!%p1256_p0), [#allocation2], %s646_s27 }
  0x52   : > { %950 = dma.done.wait (%p1257_p5), %s224_s11, 256  }
  0x53   : > { %952 = vsyncadd (%p1257_p5), %s224_s11, 4294967040  ;;  %p1258_p1 = scmp.eq.s32.totalorder %s1038_s22, 0 }
  0x55   : > { %954 = dma.done.wait (%p1258_p1), [#allocation6], 6144   ;;  %p1259_p11 = pmov %p1258_p1 }
  0x56   : > { %v260_v0 = vld [vmem:[%s227_s12] sm:$0xff]  ;;  %v261_v1 = vld [vmem:[%s227_s12 + $0x8] sm:$0xff]  ;;  %v983_v59 = vmov 0.0   ;;  %s773_s10 = smul.u32 48, %s1156_s23  ;;  %s984_s12 = smov [#allocation7]  }
  0x57   : > { %956 = vsyncadd (%p1259_p11), [#allocation6], 4294961152  ;;  %264 = vadd.xlane.f32.xlu0 %v260_v0  ;;  %v318_v10 = vld [vmem:[#allocation5 + $0x8] sm:$0xff]  ;;  %v321_v11 = vld [vmem:[#allocation5 + $0x20] sm:$0xff]  ;;  %446 = vmatprep.mubr.f32.mxu0 %v983_v59  ;;  %s774_s28 = smul.u32 768, %s1038_s22  ;;  %s541_s22 = scalar_lea.sflag [#allocation4], %s1156_s23 }
  0x58   : > { %v709_v12 = vpack.c.bf16 %v321_v11, %v318_v10  ;;  %v317_v13 = vld [vmem:[#allocation5] sm:$0xff]  ;;  %v320_v14 = vld [vmem:[#allocation5 + $0x18] sm:$0xff]  ;;  %v327_v17 = vld [vmem:[#allocation5 + $0x50] sm:$0xff]  ;;  %s257_s29 = scalar_lea.vmem [#allocation7], %s773_s10  ;;  %s909_s24 = sshll.u32 %s984_s12, 4  ;;  %s910_s24 = int_to_ptr.vmem [resolvable:$false] %s909_s24 }
  0x59   : > { %v711_v15 = vpack.c.bf16 %v320_v14, %v317_v13  ;;  %v324_v16 = vld [vmem:[#allocation5 + $0x38] sm:$0xff]  ;;  %v319_v18 = vld [vmem:[#allocation5 + $0x10] sm:$0xff]  ;;  %v322_v20 = vld [vmem:[#allocation5 + $0x28] sm:$0xff]  ;;  %s555_s13 = sshll.u32 %s257_s29, 4  ;;  %s1196_s27 = scalar_lea.hbm %s1245_s5, %s774_s28  ;;  %s1191_s13 = int_to_ptr.vmem [resolvable:$true] %s555_s13 }
  0x5a   : > { %710 = vmatprep.subr.bf16.mxu0 %v709_v12  ;;  %v713_v19 = vpack.c.bf16 %v327_v17, %v324_v16  ;;  %v323_v21 = vld [vmem:[#allocation5 + $0x30] sm:$0xff]  ;;  %v326_v22 = vld [vmem:[#allocation5 + $0x48] sm:$0xff]  ;;  %v741_v23 = vpack.c.bf16 %v322_v20, %v319_v18  ;;  %v333_v26 = vld [vmem:[#allocation5 + $0x80] sm:$0xff]  ;;  %s905_s11 = scalar_lea.vmem %s1191_s13, 768  ;;  %s911_s26 = scalar_lea.vmem %s910_s24, 1536 }
  0x5b   : > { %266 = vadd.xlane.f32.xlu0 %v261_v1  ;;  %712 = vmatpush1.bf16.msra.mxu0 %v711_v15  ;;  %v715_v24 = vpack.c.bf16 %v326_v22, %v323_v21  ;;  %v330_v25 = vld [vmem:[#allocation5 + $0x68] sm:$0xff]  ;;  %v325_v27 = vld [vmem:[#allocation5 + $0x40] sm:$0xff]  ;;  %v328_v29 = vld [vmem:[#allocation5 + $0x58] sm:$0xff]  ;;  %p906_p4 = scmp.ne.s32.totalorder %s1191_s13, %s905_s11  ;;  %p912_p10 = scmp.lt.s32.totalorder %s1191_s13, %s910_s24 }
  0x5c   : > { %714 = vmatprep.subr.bf16.mxu0 %v713_v19  ;;  %742 = vmatprep.subr.bf16.mxu1 %v741_v23  ;;  %v717_v28 = vpack.c.bf16 %v333_v26, %v330_v25  ;;  %v329_v30 = vld [vmem:[#allocation5 + $0x60] sm:$0xff]  ;;  %v332_v31 = vld [vmem:[#allocation5 + $0x78] sm:$0xff]  ;;  %v745_v32 = vpack.c.bf16 %v328_v29, %v325_v27  ;;  %v339_v35 = vld [vmem:[#allocation5 + $0xb0] sm:$0xff]  ;;  %p913_p13 = scmp.lt.s32.totalorder %s911_s26, %s905_s11 }
  0x5d   : > { %744 = vmatpush3.bf16.msra.mxu1 %v741_v23  ;;  %v719_v33 = vpack.c.bf16 %v332_v31, %v329_v30  ;;  %v336_v34 = vld [vmem:[#allocation5 + $0x98] sm:$0xff]  ;;  %v331_v36 = vld [vmem:[#allocation5 + $0x70] sm:$0xff]  ;;  %v334_v38 = vld [vmem:[#allocation5 + $0x88] sm:$0xff]  ;;  %p907_p6 = pnand %p906_p4, %p1108_p12 }
  0x5e   : > { %746 = vmatprep.subr.bf16.mxu1 %v745_v32  ;;  %v721_v37 = vpack.c.bf16 %v339_v35, %v336_v34  ;;  %v335_v39 = vld [vmem:[#allocation5 + $0x90] sm:$0xff]  ;;  %v338_v40 = vld [vmem:[#allocation5 + $0xa8] sm:$0xff]  ;;  %v749_v41 = vpack.c.bf16 %v334_v38, %v331_v36  ;;  %v345_v44 = vld [vmem:[#allocation5 + $0xe0] sm:$0xff]  ;;  %p914_p3 = por %p913_p13, %p912_p10 }
  0x5f   : > { %716 = vmatpush1.bf16.msra.mxu0 %v715_v24  ;;  %v723_v42 = vpack.c.bf16 %v338_v40, %v335_v39  ;;  %v342_v43 = vld [vmem:[#allocation5 + $0xc8] sm:$0xff]  ;;  %v337_v45 = vld [vmem:[#allocation5 + $0xa0] sm:$0xff]  ;;  %v340_v47 = vld [vmem:[#allocation5 + $0xb8] sm:$0xff]  ;;  %p908_p8 = pneg %p907_p6 }
  0x60   : > { %718 = vmatprep.subr.bf16.mxu0 %v717_v28  ;;  %v725_v46 = vpack.c.bf16 %v345_v44, %v342_v43  ;;  %v341_v48 = vld [vmem:[#allocation5 + $0xc0] sm:$0xff]  ;;  %v344_v49 = vld [vmem:[#allocation5 + $0xd8] sm:$0xff]  ;;  %v753_v50 = vpack.c.bf16 %v340_v47, %v337_v45  ;;  %v351_v53 = vld [vmem:[#allocation5 + $0x110] sm:$0xff] }
  0x61   : > { %748 = vmatpush3.bf16.msra.mxu1 %v745_v32  ;;  %v727_v51 = vpack.c.bf16 %v344_v49, %v341_v48  ;;  %v348_v52 = vld [vmem:[#allocation5 + $0xf8] sm:$0xff]  ;;  %v343_v54 = vld [vmem:[#allocation5 + $0xd0] sm:$0xff]  ;;  %v346_v56 = vld [vmem:[#allocation5 + $0xe8] sm:$0xff]  ;;  %p915_p7 = pnand %p914_p3, %p908_p8 }
  0x62   : > { %750 = vmatprep.subr.bf16.mxu1 %v749_v41  ;;  %v729_v55 = vpack.c.bf16 %v351_v53, %v348_v52  ;;  %v347_v57 = vld [vmem:[#allocation5 + $0xf0] sm:$0xff]  ;;  %v350_v58 = vld [vmem:[#allocation5 + $0x108] sm:$0xff]  ;;  %v757_v60 = vpack.c.bf16 %v346_v56, %v343_v54  ;;  %v357_v63 = vld [vmem:[#allocation5 + $0x140] sm:$0xff] }
  0x63   : > { %720 = vmatpush1.bf16.msra.mxu0 %v719_v33  ;;  %v731_v61 = vpack.c.bf16 %v350_v58, %v347_v57  ;;  %v354_v62 = vld [vmem:[#allocation5 + $0x128] sm:$0xff]  ;;  %v355_v10 = vld [vmem:[#allocation5 + $0x130] sm:$0xff]  ;;  %v361_v18 = vld [vmem:[#allocation5 + $0x160] sm:$0xff] }
  0x64   : > { %722 = vmatprep.subr.bf16.mxu0 %v721_v37  ;;  %v358_v11 = vld [vmem:[#allocation5 + $0x148] sm:$0xff]  ;;  %v359_v14 = vld [vmem:[#allocation5 + $0x150] sm:$0xff]  ;;  %v364_v19 = vld [vmem:[#allocation5 + $0x178] sm:$0xff] }
  0x65   : > { %752 = vmatpush3.bf16.msra.mxu1 %v749_v41  ;;  %v362_v15 = vld [vmem:[#allocation5 + $0x168] sm:$0xff]  ;;  %v765_v16 = vpack.c.bf16 %v358_v11, %v355_v10  ;;  %v769_v20 = vpack.c.bf16 %v364_v19, %v361_v18  ;;  %v648_v38 = vld [vmem:[%s1241_s1] ss:$0 sm:$0xff] }
  0x66   : > { %754 = vmatprep.subr.bf16.mxu1 %v753_v50  ;;  %v739_v17 = vpack.c.bf16 %v362_v15, %v359_v14  ;;  %v649_v40 = vld [vmem:[%s1242_s2] ss:$0 sm:$0xff] }
  0x67   : > { %724 = vmatpush1.bf16.msra.mxu0 %v723_v42  ;;  %v365_v49 = vld [vmem:[%s1244_s4] sm:$0x7] }
  0x68   : > { %726 = vmatprep.subr.bf16.mxu0 %v725_v46 }
  0x69   : > { %756 = vmatpush3.bf16.msra.mxu1 %v753_v50 }
  0x6a   : > { %758 = vmatprep.subr.bf16.mxu1 %v757_v60 }
  0x6b   : > { %728 = vmatpush1.bf16.msra.mxu0 %v727_v51 }
  0x6c   : > { %730 = vmatprep.subr.bf16.mxu0 %v729_v55 }
  0x6d   : > { %760 = vmatpush3.bf16.msra.mxu1 %v757_v60 }
  0x6f   : > { %732 = vmatpush1.bf16.msra.mxu0 %v731_v61 }
  0xe4   : > { %v265_v2 = vpop.xlane.xlu0 %264 }
  0xe5   : > { %v269_v3 = vmul.f32 0.0078125, %v265_v2  ;;  %v352_v2 = vld [vmem:[#allocation5 + $0x118] sm:$0xff] }
  0xe7   : > { %v1168_v4 = vsub.f32 %v260_v0, %v269_v3  ;;  %v349_v0 = vld [vmem:[#allocation5 + $0x100] sm:$0xff] }
  0xe8   : > { %v267_v5 = vpop.xlane.xlu0 %266  ;;  %v353_v3 = vld [vmem:[#allocation5 + $0x120] sm:$0xff] }
  0xe9   : > { %v270_v6 = vmul.f32 0.0078125, %v267_v5  ;;  %v273_v7 = vmul.f32 %v1168_v4, %v1168_v4  ;;  %v356_v5 = vld [vmem:[#allocation5 + $0x138] sm:$0xff] }
  0xea   : > { %v735_v12 = vpack.c.bf16 %v356_v5, %v353_v3 }
  0xeb   : > { %v1172_v8 = vsub.f32 %v261_v1, %v270_v6  ;;  %275 = vadd.xlane.f32.xlu1 %v273_v7  ;;  %v733_v1 = vpack.c.bf16 %v357_v63, %v354_v62  ;;  %v761_v6 = vpack.c.bf16 %v352_v2, %v349_v0  ;;  %v360_v7 = vld [vmem:[#allocation5 + $0x158] sm:$0xff] }
  0xed   : > { %v274_v9 = vmul.f32 %v1172_v8, %v1172_v8  ;;  %734 = vmatprep.subr.bf16.mxu0 %v733_v1  ;;  %762 = vmatprep.subr.bf16.mxu1 %v761_v6 }
  0xee   : > { %736 = vmatpush1.bf16.msra.mxu0 %v735_v12  ;;  %764 = vmatpush3.bf16.msra.mxu1 %v761_v6 }
  0xef   : > { %277 = vadd.xlane.f32.xlu1 %v274_v9  ;;  %v363_v9 = vld [vmem:[#allocation5 + $0x170] sm:$0xff]  ;;  %766 = vmatprep.subr.bf16.mxu1 %v765_v16 }
  0xf0   : > { %v737_v13 = vpack.c.bf16 %v363_v9, %v360_v7 }
  0xf2   : > { %738 = vmatprep.subr.bf16.mxu0 %v737_v13  ;;  %768 = vmatpush3.bf16.msra.mxu1 %v765_v16 }
  0xf3   : > { %740 = vmatpush1.bf16.msra.mxu0 %v739_v17  ;;  %770 = vmatprep.subr.bf16.mxu1 %v769_v20 }
  0xf6   : > { %772 = vmatpush3.bf16.msra.mxu1 %v769_v20 }
 0x178   : > { %v276_v21 = vpop.xlane.xlu1 %275 }
 0x179   : > { %v279_v22 = vmul.f32 0.007874016, %v276_v21 }
 0x17b   : > { %839 = vrsqrt.f32 %v279_v22  ;;  %vm283_vm0 = vcmp.eq.f32.partialorder %v279_v22, inf  ;;  %v286_v27 = vand.u32 2147483648, %v279_v22  ;;  %vm285_vm1 = vcmp.eq.f32.partialorder %v279_v22, 0.0 }
 0x17c   : > { %v278_v23 = vpop.xlane.xlu1 %277 }
 0x17d   : > { %v280_v24 = vmul.f32 0.007874016, %v278_v23 }
 0x17f   : > { %841 = vrsqrt.f32 %v280_v24  ;;  %vm290_vm2 = vcmp.eq.f32.partialorder %v280_v24, inf  ;;  %v293_v33 = vand.u32 2147483648, %v280_v24  ;;  %vm292_vm3 = vcmp.eq.f32.partialorder %v280_v24, 0.0 }
 0x185   : > { %v840_v25 = vpop.eup %839 }
 0x186   : > { %v282_v26 = vmul.f32 %v840_v25, %v279_v22 }
 0x188   : > { %v284_v28 = vsel %vm283_vm0, %v279_v22, %v282_v26 }
 0x189   : > { %v842_v29 = vpop.eup %841  ;;  %v287_v30 = vsel %vm285_vm1, %v286_v27, %v284_v28 }
 0x18a   : > { %v289_v31 = vmul.f32 %v842_v29, %v280_v24  ;;  %v295_v32 = vadd.f32 1e-06, %v287_v30 }
 0x18c   : > { %v291_v34 = vsel %vm290_vm2, %v280_v24, %v289_v31  ;;  %843 = vrcp.f32 %v295_v32 }
 0x18d   : > { %v294_v35 = vsel %vm292_vm3, %v293_v33, %v291_v34 }
 0x18e   : > { %v296_v36 = vadd.f32 1e-06, %v294_v35 }
 0x190   : > { %845 = vrcp.f32 %v296_v36 }
 0x196   : > { %v844_v37 = vpop.eup %843 }
 0x197   : > { %v299_v39 = vmul.f32 %v844_v37, %v1168_v4  ;;  %v367_v4 = vlaneseq }
 0x199   : > { %v307_v41 = vmul.f32 %v648_v38, %v299_v39  ;;  %v368_v47 = vshrl.u32 %v367_v4, 7 }
 0x19a   : > { %v846_v42 = vpop.eup %845 }
 0x19b   : > { %v315_v43 = vadd.f32 %v649_v40, %v307_v41  ;;  %v300_v44 = vmul.f32 %v846_v42, %v1172_v8  ;;  %v369_v48 = vsub.s32 0, %v368_v47  ;;  %v373_v50 = vsub.s32 1, %v368_v47 }
 0x19c   : > { %v377_v8 = vsub.s32 2, %v368_v47 }
 0x19d   : > { %447 = vmatmul.mubr.f32.vlgmr.msra.gmra.mrb[0].mxu0 %v315_v43  ;;  %706 = vmatprep.mubr.f32.mxu1 %v315_v43  ;;  %v308_v45 = vmul.f32 %v648_v38, %v300_v44  ;;  %v370_v51 = vrot.slane %v365_v49, %v369_v48  ;;  %v374_v52 = vrot.slane %v365_v49, %v373_v50 }
 0x19e   : > { %452 = vmatprep.mubr.f32.mxu0 %v983_v59  ;;  %v378_v56 = vrot.slane %v365_v49, %v377_v8 }
 0x19f   : > { %v316_v46 = vadd.f32 %v649_v40, %v308_v45 }
 0x1a1   : > { %453 = vmatmul.mubr.f32.gmra.mrb[2].mxu0 %v316_v46  ;;  %707 = vmatmul.mubr.f32.vlgmr.msra.gmra.mrb[0].mxu1 %v316_v46 }
 0x270   : > { %v448_v53 = vpop.f32.mrb[0].mxu0 }
 0x271   : > { %v449_v54 = vadd.f32 %v448_v53, %v370_v51  ;;  %v450_v55 = vpop.f32.mrb[1].mxu0 }
 0x272   : > { %v451_v57 = vadd.f32 %v450_v55, %v374_v52 }
 0x273   : > { %534 = vst [vmem:[%s257_s29] sm:$0xff] %v449_v54 }
 0x274   : > { %535 = vst [vmem:[%s257_s29 + $0x8] sm:$0xff] %v451_v57  ;;  %v454_v58 = vpop.f32.mrb[2].mxu0  ;;  %v708_v59 = vpop.f32.mrb[0].mxu1 }
 0x275   : > { %v455_v60 = vadd.f32 %v454_v58, %v370_v51  ;;  %v531_v61 = vadd.f32 %v708_v59, %v378_v56  ;;  %v456_v62 = vpop.f32.mrb[3].mxu0  ;;  %v525_v63 = vpop.f32.mrb[1].mxu1 }
 0x276   : > { %v457_v0 = vadd.f32 %v456_v62, %v374_v52  ;;  %v526_v1 = vadd.f32 %v525_v63, %v378_v56 }
 0x277   : > { %537 = vst [vmem:[%s257_s29 + $0x18] sm:$0xff] %v455_v60  ;;  %539 = vst [vmem:[%s257_s29 + $0x28] sm:$0xff] %v531_v61 }
 0x278   : > { %538 = vst [vmem:[%s257_s29 + $0x20] sm:$0xff] %v457_v0  ;;  %536 = vst [vmem:[%s257_s29 + $0x10] sm:$0xff] %v526_v1 }
 0x279   : > { %918 = shalt.err (!%p915_p7)
}
 0x27a   : > { %s919_s14 = scalar_lea.hbm %s1196_s27, 768  ;;  %s923_s15 = scalar_lea.hbm %s1245_s5, 1536 }
 0x27b   : > { %p920_p9 = scmp.ne.s32.totalorder %s1196_s27, %s919_s14  ;;  %p924_p5 = scmp.lt.u32.totalorder %s1196_s27, %s1245_s5 }
 0x27c   : > { %p925_p1 = scmp.lt.u32.totalorder %s923_s15, %s919_s14  ;;  %p927_p4 = scmp.lt.u32.totalorder %s919_s14, %s1196_s27 }
 0x27d   : > { %p921_p2 = pnand %p920_p9, %p1108_p12 }
 0x27e   : > { %p926_p11 = por %p925_p1, %p924_p5 }
 0x27f   : > { %p922_p0 = pneg %p921_p2 }
 0x280   : > { %p928_p6 = por %p927_p4, %p926_p11 }
 0x282   : > { %p929_p8 = pnand %p928_p6, %p922_p0 }
 0x284   : > { %932 = shalt.err (!%p929_p8)
}
 0x285   : > { %s985_s28 = smov 384   ;;  %s986_s16 = smov 24  }
 0x286   : > { %781 = dma.vmem_to_hbm [thread:$0]  (%p1108_p12), %s1191_s13, 768, %s1196_s27, %s541_s22, %s985_s28, %s985_s28, %s986_s16  }
 0x287 PF: > { %s570_s17 = sand.u32 1, %s963_s18   ;;  %p1260_p10 = scmp.ne.s32.totalorder %s1250_s25, 0 }
 0x288   : > { %p1261_p13 = scmp.ge.s32.totalorder %s975_s21, 2  ;;  %s571_s11 = scalar_lea.sflag [#allocation4], %s570_s17 }
 0x28a   : > { %p792_p3 = pnand %p1261_p13, %p1260_p10 }
 0x28c   : > { %958 = dma.done.wait (!%p792_p3), %s571_s11, 768  }
 0x28d   : > { %960 = vsyncadd (!%p792_p3), %s571_s11, 4294966528  ;;  %p19_p7 = scmp.ge.s32.totalorder %s1073_s30, 4   ;;  %s1262_s18 = smov %s967_s19 }
 0x28e   : > { %s1263_s19 = smov %s971_s20  ;;  %s1264_s20 = smov %s1104_s8 }
 0x28f   : > { %s1265_s21 = smov %s1073_s30  ;;  %21 = sbr.rel (!%p19_p7) target bundleno = 6 (0x6), region = 89 }
 0x296   :  { %576 = vsyncpa [#allocation3], 1 }
 0x297   :  { %578 = vsyncpa [#allocation3 + $0x1], 1 }
 0x298   :  { %579 = vsyncpa [#allocation6], 1 }
 0x299   :  { %580 = vsyncpa [#allocation4], 1 }
 0x29a   :  { %582 = vsyncpa [#allocation4 + $0x1], 1 }

</bundles_post_ra>
